<compile_context>
chip_gen: v7x
topology: tpu7x:2x2x1
jax: 0.10.0
libtpu: 0.0.40
codegen_flags: <defaults>
</compile_context>

<pallas_src>
import functools
import math

import numpy as np
import jax
import jax.numpy as jnp
from jax import lax
from jax.experimental import pallas as pl
from jax.experimental.pallas import tpu as pltpu


# --------------------------------------------------------------------------------------
# Fused top-1 gate kernel: logits -> softmax -> argmax -> global positions (running
# per-expert offsets + one triangular bf16 matmul) -> capacity trim -> lane-dense flat
# combine-weights / dispatch-mask stores; l_aux & exp_counts emitted at the last tile.
# --------------------------------------------------------------------------------------
def _fused_top1_gate_kernel(x_ref, wt_ref, cw_ref, dm_ref, laux_ref, cnt_ref,
                            tri_ref, cnt_acc, gsum_acc, *, capacity, num_tokens):
    step = pl.program_id(0)
    tS = x_ref.shape[0]
    E = wt_ref.shape[1]
    C = capacity

    @pl.when(step == 0)
    def _init():
        cnt_acc[...] = jnp.zeros_like(cnt_acc)
        gsum_acc[...] = jnp.zeros_like(gsum_acc)
        row = lax.broadcasted_iota(jnp.int32, (tS, tS), 0)
        col = lax.broadcasted_iota(jnp.int32, (tS, tS), 1)
        tri_ref[...] = (row >= col).astype(tri_ref.dtype)   # built once, lives in scratch

    # Gate logits on the MXU: bf16 inputs (x cast in-kernel on the VPU), f32 accumulation.
    logits = jnp.dot(x_ref[...].astype(jnp.bfloat16), wt_ref[...],
                     preferred_element_type=jnp.float32)                      # (tS, E)

    # Softmax over experts (f32).
    row_max = jnp.max(logits, axis=1, keepdims=True)
    ex = jnp.exp(logits - row_max)
    gates = ex / jnp.sum(ex, axis=1, keepdims=True)                           # (tS, E)

    # Argmax over experts (first occurrence) -> one-hot.
    col_iota = lax.broadcasted_iota(jnp.int32, (tS, E), 1)
    gate1 = jnp.max(gates, axis=1, keepdims=True)                             # (tS, 1)
    idx = jnp.min(jnp.where(gates == gate1, col_iota, E), axis=1, keepdims=True)  # (tS, 1)
    onehot = col_iota == idx                                                  # (tS, E) bool
    onehot_f = onehot.astype(jnp.float32)

    # Global pre-trim positions: running per-expert counts of previous tiles (scratch) plus
    # an intra-tile inclusive cumsum as ONE lower-triangular bf16 matmul (exact, f32 acc).
    off = cnt_acc[...]                                                        # (1, E) f32
    csum = jnp.dot(tri_ref[...], onehot.astype(jnp.bfloat16),
                   preferred_element_type=jnp.float32)                        # (tS, E)
    loc_pre = csum + off - 1.0

    # Capacity trim. Kept tokens keep their pre-trim slot, so no second cumsum is needed.
    loc_own = jnp.sum(loc_pre * onehot_f, axis=1, keepdims=True)              # (tS, 1) slot
    kept = loc_own < float(C)                                                 # (tS, 1) bool
    flat_pos = jnp.where(kept, idx * C + loc_own.astype(jnp.int32), -1)       # (tS, 1) int32

    # Lane-dense flat (tS, E*C) stores: exactly one nonzero per kept token at j = e*C + c.
    j_iota = lax.broadcasted_iota(jnp.int32, (tS, E * C), 1)
    hit = j_iota == flat_pos                                                  # (tS, E*C) bool
    cw_ref[...] = jnp.where(hit, gate1, 0.0).astype(cw_ref.dtype)
    dm_ref[...] = hit.astype(dm_ref.dtype)                                    # bool output

    # Running stats (pre-trim counts per DeepSpeed semantics) for offsets / l_aux / exp_counts.
    cnt_acc[...] = off + jnp.sum(onehot_f, axis=0, keepdims=True)
    gsum_acc[...] = gsum_acc[...] + jnp.sum(gates, axis=0, keepdims=True)

    @pl.when(step == pl.num_programs(0) - 1)
    def _finalize():
        tot_c = cnt_acc[...]
        tot_g = gsum_acc[...]
        scale = float(E) / float(num_tokens) / float(num_tokens)
        laux_ref[...] = jnp.sum(tot_g * tot_c, axis=1, keepdims=True) * scale
        cnt_ref[...] = tot_c.astype(jnp.int32)


def _pick_vmem_limit():
    """Explicit scoped-VMEM limit: ~3/4 of per-core VMEM (<= 100 MiB), 48 MiB fallback."""
    try:
        phys = int(pltpu.get_tpu_info().vmem_capacity_bytes)
    except Exception:
        phys = 64 << 20    # conservative: v7x per-TensorCore VMEM
    return max(min(phys * 3 // 4, 100 << 20), 32 << 20)


def _choose_token_tile(S, M, E, C, cw_bytes, budget):
    """Largest token tile whose fused-kernel VMEM working set fits the budget."""
    def working_set(t):
        x_buf = 2 * t * M * 4                          # x block (f32), double-buffered
        w_buf = 2 * M * E * 2                          # bf16 gate weight, double-buffered
        tri = t * t * 2                                # bf16 triangular scratch (single copy)
        out = 2 * t * E * C * (cw_bytes + 1)           # cw + bool dm blocks, double-buffered
        tmp = 5 * t * E * C + 32 * t * 4               # in-kernel temporaries (slack)
        return x_buf + w_buf + tri + out + tmp + (2 << 20)

    for t in (1024, 512, 256, 128, 64, 32, 16, 8):
        if S % t == 0 and working_set(t) <= budget:
            return t
    # TODO(synk): pad S up to a tile multiple and mask tail rows instead of whole-array tiles.
    best = None
    for t in range(8, S, 8):
        if S % t == 0 and working_set(t) <= budget:
            best = t
    return best if best is not None else S


def top1_gate_pallas(x, w, capacity, *, token_tile=None, combine_dtype=jnp.float32):
    """x: (S, M); w: (E, M) (torch.nn.Linear weight layout).

    Returns (l_aux scalar f32,
             combine_weights (S, E*C) in `combine_dtype` (lane-dense flat e*c layout),
             dispatch_mask   (S, E*C) bool,
             exp_counts (E,) int32)."""
    S, M = x.shape
    E = w.shape[0]
    C = int(capacity)
    assert S < (1 << 24), "position arithmetic uses exact f32 integers; needs S < 2**24"

    vmem_limit = _pick_vmem_limit()
    cw_bytes = jnp.dtype(combine_dtype).itemsize
    if token_tile is not None:
        tS = int(token_tile)
    else:
        tS = _choose_token_tile(S, M, E, C, cw_bytes, vmem_limit - (4 << 20))
    if S % tS != 0:
        # TODO(synk): pad S to a tile multiple and mask tail rows instead of one big tile.
        tS = S
    nt = S // tS

    wt_bf = jnp.transpose(w).astype(jnp.bfloat16)      # (M, E) -- tiny, one-time

    kernel = functools.partial(_fused_top1_gate_kernel, capacity=C, num_tokens=S)
    cw_flat, dm_flat, laux, cnt = pl.pallas_call(
        kernel,
        out_shape=(
            jax.ShapeDtypeStruct((S, E * C), combine_dtype),   # combine weights, flat & lane-dense
            jax.ShapeDtypeStruct((S, E * C), jnp.bool_),       # dispatch mask (bool directly)
            jax.ShapeDtypeStruct((1, 1), jnp.float32),         # l_aux
            jax.ShapeDtypeStruct((1, E), jnp.int32),           # exp_counts
        ),
        grid=(nt,),
        in_specs=[
            pl.BlockSpec((tS, M), lambda i: (i, 0)),
            pl.BlockSpec((M, E), lambda i: (0, 0)),
        ],
        out_specs=(
            pl.BlockSpec((tS, E * C), lambda i: (i, 0)),
            pl.BlockSpec((tS, E * C), lambda i: (i, 0)),
            pl.BlockSpec((1, 1), lambda i: (0, 0)),
            pl.BlockSpec((1, E), lambda i: (0, 0)),
        ),
        scratch_shapes=[
            pltpu.VMEM((tS, tS), jnp.bfloat16),   # lower-triangular cumsum matrix (built once)
            pltpu.VMEM((1, E), jnp.float32),      # running pre-trim expert counts (== offsets)
            pltpu.VMEM((1, E), jnp.float32),      # running gate sums (for l_aux)
        ],
        compiler_params=pltpu.CompilerParams(
            dimension_semantics=("arbitrary",),   # sequential: offsets carry across token tiles
            vmem_limit_bytes=vmem_limit,
        ),
    )(x, wt_bf)

    return laux[0, 0], cw_flat, dm_flat, cnt[0]


class TopKGate:
    """JAX/Pallas port of deepspeed TopKGate (k == 1 / top1gating path)."""

    def __init__(self, model_dim, num_experts, k=1, capacity_factor=1.0,
                 eval_capacity_factor=1.0, min_capacity=8, *, key):
        assert k == 1, "only the k == 1 (top1gating) path is implemented"
        self.k = k
        self.capacity_factor = capacity_factor
        self.eval_capacity_factor = eval_capacity_factor
        self.min_capacity = min_capacity
        # torch.nn.Linear default init: U(-1/sqrt(fan_in), 1/sqrt(fan_in))
        bound = 1.0 / math.sqrt(model_dim)
        self.wg = jax.random.uniform(key, (num_experts, model_dim),
                                     jnp.float32, -bound, bound)

    def __call__(self, x, *, training=True, token_tile=None,
                 combine_dtype=jnp.float32, flat_ec_layout=False):
        S = x.shape[0]
        E = self.wg.shape[0]
        cf = self.capacity_factor if training else self.eval_capacity_factor
        capacity = max(int(math.ceil(S / E * cf)), self.min_capacity)
        assert S >= self.min_capacity, "num tokens must be >= min_capacity"
        l_aux, cw, dm, cnt = top1_gate_pallas(x, self.wg, capacity,
                                              token_tile=token_tile,
                                              combine_dtype=combine_dtype)
        if flat_ec_layout:
            # Lane-dense (S, E*C) layout straight from the kernel: this is the layout DeepSpeed's
            # dispatch/combine einsums flatten to anyway, so fused consumers should use it.
            return l_aux, cw, dm, cnt
        # Module-faithful (S, E, C) shapes. NOTE: when C is not a multiple of 128 this reshape
        # is a full XLA relayout copy of the two big arrays -- pass flat_ec_layout=True to skip.
        return (l_aux, cw.reshape(S, E, capacity), dm.reshape(S, E, capacity), cnt)


# --------------------------------------------------------------------------------------
# Pure-JAX reference matching top1gating (drop_tokens=True, use_rts=False), including the
# (unoptimized) second cumsum, so it independently validates the kernel's shortcut. The
# gate matmul uses the same bf16 MXU precision as the kernel.
# --------------------------------------------------------------------------------------
def _reference_top1gate(x, w, capacity):
    logits = jnp.dot(x.astype(jnp.bfloat16), w.T.astype(jnp.bfloat16),
                     preferred_element_type=jnp.float32)
    gates = jax.nn.softmax(logits, axis=1)
    S, E = gates.shape
    idx = jnp.argmax(gates, axis=1)
    mask1 = jax.nn.one_hot(idx, E, dtype=jnp.int32)
    exp_counts = jnp.sum(mask1, axis=0)
    me = jnp.mean(gates, axis=0)
    ce = jnp.mean(mask1.astype(jnp.float32), axis=0)
    l_aux = jnp.sum(me * ce) * E
    loc_pre = jnp.cumsum(mask1, axis=0) - 1
    mask1 = mask1 * (loc_pre < capacity).astype(jnp.int32)
    locations1 = jnp.cumsum(mask1, axis=0) - 1
    locations1_s = jnp.sum(locations1 * mask1, axis=1)
    gates_m = gates * mask1.astype(jnp.float32)
    loc_sc = jax.nn.one_hot(locations1_s, capacity, dtype=jnp.float32)
    cw = jnp.einsum('se,sc->sec', gates_m, loc_sc)
    return l_aux, cw, cw.astype(bool), exp_counts


if __name__ == "__main__":
    key = jax.random.PRNGKey(0)
    k1, k2, k3, k4 = jax.random.split(key, 4)

    # --- small single-tile case: module-faithful (S, E, C) outputs ---
    S, M, E = 16, 32, 4
    x = jax.random.normal(k1, (S, M), jnp.float32)
    gate = TopKGate(M, E, k=1, capacity_factor=1.0, min_capacity=8, key=k2)
    l_aux, cw, dm, cnt = gate(x)
    jax.block_until_ready((l_aux, cw, dm, cnt))

    C = max(int(math.ceil(S / E * 1.0)), 8)
    r_laux, r_cw, r_dm, r_cnt = _reference_top1gate(x, gate.wg, C)
    np.testing.assert_allclose(np.asarray(l_aux), np.asarray(r_laux), rtol=1e-4, atol=1e-5)
    np.testing.assert_allclose(np.asarray(cw), np.asarray(r_cw), rtol=1e-4, atol=1e-5)
    np.testing.assert_array_equal(np.asarray(dm), np.asarray(r_dm))
    np.testing.assert_array_equal(np.asarray(cnt), np.asarray(r_cnt))

    # --- multi-tile case (cross-tile offsets + capacity dropping), flat fused-consumer layout ---
    S2, M2, E2 = 512, 64, 8
    x2 = jax.random.normal(k3, (S2, M2), jnp.float32)
    gate2 = TopKGate(M2, E2, k=1, capacity_factor=0.5, min_capacity=8, key=k4)
    l2, cw2, dm2, cnt2 = gate2(x2, token_tile=256, flat_ec_layout=True)
    jax.block_until_ready((l2, cw2, dm2, cnt2))

    C2 = max(int(math.ceil(S2 / E2 * 0.5)), 8)
    r2_laux, r2_cw, r2_dm, r2_cnt = _reference_top1gate(x2, gate2.wg, C2)
    np.testing.assert_allclose(np.asarray(l2), np.asarray(r2_laux), rtol=1e-4, atol=1e-5)
    np.testing.assert_allclose(np.asarray(cw2).reshape(S2, E2, C2), np.asarray(r2_cw),
                               rtol=1e-4, atol=1e-5)
    np.testing.assert_array_equal(np.asarray(dm2).reshape(S2, E2, C2), np.asarray(r2_dm))
    np.testing.assert_array_equal(np.asarray(cnt2), np.asarray(r2_cnt))

    print("KERNEL_OK")
</pallas_src>

<mosaic_0001>
module attributes {stable_mosaic.version = 11 : i64} {
  func.func @_fused_top1_gate_kernel(%arg0: i32, %arg1: memref<16x32xf32, #tpu.memory_space<vmem>>, %arg2: memref<32x4xbf16, #tpu.memory_space<vmem>>, %arg3: memref<16x32xf32, #tpu.memory_space<vmem>>, %arg4: memref<16x32xi32, #tpu.memory_space<vmem>>, %arg5: memref<1x1xf32, #tpu.memory_space<vmem>>, %arg6: memref<1x4xi32, #tpu.memory_space<vmem>>, %arg7: memref<16x16xbf16, #tpu.memory_space<vmem>>, %arg8: memref<1x4xf32, #tpu.memory_space<vmem>>, %arg9: memref<1x4xf32, #tpu.memory_space<vmem>>) attributes {dimension_semantics = [#tpu.dimension_semantics<arbitrary>], iteration_bounds = array<i64: 1>, scalar_prefetch = 0 : i64, scratch_operands = 3 : i64, tpu.core_type = #tpu.core_type<tc>, window_params = [{transform_indices = @transform_0, window_bounds = array<i64: 16, 32>}, {pipeline_mode = #tpu.pipeline_mode<synchronous>, transform_indices = @transform_1, window_bounds = array<i64: 32, 4>}, {transform_indices = @transform_2, window_bounds = array<i64: 16, 32>}, {transform_indices = @transform_3, window_bounds = array<i64: 16, 32>}, {pipeline_mode = #tpu.pipeline_mode<synchronous>, transform_indices = @transform_4, window_bounds = array<i64: 1, 1>}, {pipeline_mode = #tpu.pipeline_mode<synchronous>, transform_indices = @transform_5, window_bounds = array<i64: 1, 4>}]} {
    %c0_i32 = arith.constant 0 : i32
    %0 = arith.cmpi eq, %arg0, %c0_i32 : i32
    %1 = arith.extui %0 : i1 to i32
    %c0_i32_0 = arith.constant 0 : i32
    %2 = arith.cmpi ne, %1, %c0_i32_0 : i32
    scf.if %2 {
      %cst_32 = arith.constant 0.000000e+00 : f32
      %73 = vector.broadcast %cst_32 : f32 to vector<1x4xf32>
      %c0_33 = arith.constant 0 : index
      %c0_34 = arith.constant 0 : index
      %74 = vector.load %arg8[%c0_33, %c0_34] : memref<1x4xf32, #tpu.memory_space<vmem>>, vector<1x4xf32>
      tpu.vector_store %arg8[%c0_33, %c0_34], %73 {strides = array<i32>} : memref<1x4xf32, #tpu.memory_space<vmem>>, vector<1x4xf32>,
      %cst_35 = arith.constant 0.000000e+00 : f32
      %75 = vector.broadcast %cst_35 : f32 to vector<1x4xf32>
      %c0_36 = arith.constant 0 : index
      %c0_37 = arith.constant 0 : index
      %76 = vector.load %arg9[%c0_36, %c0_37] : memref<1x4xf32, #tpu.memory_space<vmem>>, vector<1x4xf32>
      tpu.vector_store %arg9[%c0_36, %c0_37], %75 {strides = array<i32>} : memref<1x4xf32, #tpu.memory_space<vmem>>, vector<1x4xf32>,
      %77 = tpu.iota {dimensions = array<i32: 0>} : vector<16x16xi32>
      %78 = tpu.iota {dimensions = array<i32: 1>} : vector<16x16xi32>
      %79 = arith.cmpi sge, %77, %78 : vector<16x16xi32>
      %80 = arith.extui %79 : vector<16x16xi1> to vector<16x16xi32>
      %81 = arith.sitofp %80 : vector<16x16xi32> to vector<16x16xf32>
      %82 = arith.truncf %81 : vector<16x16xf32> to vector<16x16xbf16>
      %c0_38 = arith.constant 0 : index
      %c0_39 = arith.constant 0 : index
      %83 = vector.load %arg7[%c0_38, %c0_39] : memref<16x16xbf16, #tpu.memory_space<vmem>>, vector<16x16xbf16>
      tpu.vector_store %arg7[%c0_38, %c0_39], %82 {strides = array<i32>} : memref<16x16xbf16, #tpu.memory_space<vmem>>, vector<16x16xbf16>,
    } else {
    }
    %c0 = arith.constant 0 : index
    %c0_1 = arith.constant 0 : index
    %3 = vector.load %arg1[%c0, %c0_1] : memref<16x32xf32, #tpu.memory_space<vmem>>, vector<16x32xf32>
    %4 = arith.truncf %3 : vector<16x32xf32> to vector<16x32xbf16>
    %c0_2 = arith.constant 0 : index
    %c0_3 = arith.constant 0 : index
    %5 = vector.load %arg2[%c0_2, %c0_3] : memref<32x4xbf16, #tpu.memory_space<vmem>>, vector<32x4xbf16>
    %cst = arith.constant dense<0.000000e+00> : vector<16x4xf32>
    %6 = tpu.matmul %4, %5, %cst {dimension_numbers = #tpu.dot_dimension_numbers<[1], [0], [0], [1], [0, 0, 1, 1], [], []>} : vector<16x32xbf16>, vector<32x4xbf16>, vector<16x4xf32> -> vector<16x4xf32>
    %cst_4 = arith.constant dense<0xFF800000> : vector<16xf32>
    %7 = vector.multi_reduction <maximumf>, %6, %cst_4 [1] : vector<16x4xf32> to vector<16xf32>
    %8 = vector.shape_cast %7 : vector<16xf32> to vector<16x1xf32>
    %9 = vector.broadcast %8 : vector<16x1xf32> to vector<16x4xf32>
    %10 = arith.subf %6, %9 : vector<16x4xf32>
    %11 = math.exp %10 : vector<16x4xf32>
    %cst_5 = arith.constant dense<0.000000e+00> : vector<16xf32>
    %12 = vector.multi_reduction <add>, %11, %cst_5 [1] : vector<16x4xf32> to vector<16xf32>
    %13 = vector.shape_cast %12 : vector<16xf32> to vector<16x1xf32>
    %14 = vector.broadcast %13 : vector<16x1xf32> to vector<16x4xf32>
    %15 = arith.divf %11, %14 : vector<16x4xf32>
    %16 = tpu.iota {dimensions = array<i32: 1>} : vector<16x4xi32>
    %cst_6 = arith.constant dense<0xFF800000> : vector<16xf32>
    %17 = vector.multi_reduction <maximumf>, %15, %cst_6 [1] : vector<16x4xf32> to vector<16xf32>
    %18 = vector.shape_cast %17 : vector<16xf32> to vector<16x1xf32>
    %19 = vector.broadcast %18 : vector<16x1xf32> to vector<16x4xf32>
    %20 = arith.cmpf oeq, %15, %19 : vector<16x4xf32>
    %c4_i32 = arith.constant 4 : i32
    %21 = vector.broadcast %c4_i32 : i32 to vector<16x4xi32>
    %22 = arith.select %20, %16, %21 : vector<16x4xi1>, vector<16x4xi32>
    %cst_7 = arith.constant dense<2147483647> : vector<16xi32>
    %23 = vector.multi_reduction <minsi>, %22, %cst_7 [1] : vector<16x4xi32> to vector<16xi32>
    %24 = vector.shape_cast %23 : vector<16xi32> to vector<16x1xi32>
    %25 = vector.broadcast %24 : vector<16x1xi32> to vector<16x4xi32>
    %26 = arith.cmpi eq, %16, %25 : vector<16x4xi32>
    %27 = arith.extui %26 : vector<16x4xi1> to vector<16x4xi32>
    %28 = arith.sitofp %27 : vector<16x4xi32> to vector<16x4xf32>
    %c0_8 = arith.constant 0 : index
    %c0_9 = arith.constant 0 : index
    %29 = vector.load %arg8[%c0_8, %c0_9] : memref<1x4xf32, #tpu.memory_space<vmem>>, vector<1x4xf32>
    %c0_10 = arith.constant 0 : index
    %c0_11 = arith.constant 0 : index
    %30 = vector.load %arg7[%c0_10, %c0_11] : memref<16x16xbf16, #tpu.memory_space<vmem>>, vector<16x16xbf16>
    %31 = arith.extui %26 : vector<16x4xi1> to vector<16x4xi32>
    %32 = arith.sitofp %31 : vector<16x4xi32> to vector<16x4xf32>
    %33 = arith.truncf %32 : vector<16x4xf32> to vector<16x4xbf16>
    %cst_12 = arith.constant dense<0.000000e+00> : vector<16x4xf32>
    %34 = tpu.matmul %30, %33, %cst_12 {dimension_numbers = #tpu.dot_dimension_numbers<[1], [0], [0], [1], [0, 0, 1, 1], [], []>} : vector<16x16xbf16>, vector<16x4xbf16>, vector<16x4xf32> -> vector<16x4xf32>
    %35 = vector.broadcast %29 : vector<1x4xf32> to vector<16x4xf32>
    %36 = arith.addf %34, %35 : vector<16x4xf32>
    %cst_13 = arith.constant 1.000000e+00 : f32
    %37 = vector.broadcast %cst_13 : f32 to vector<16x4xf32>
    %38 = arith.subf %36, %37 : vector<16x4xf32>
    %39 = arith.mulf %38, %28 : vector<16x4xf32>
    %cst_14 = arith.constant dense<0.000000e+00> : vector<16xf32>
    %40 = vector.multi_reduction <add>, %39, %cst_14 [1] : vector<16x4xf32> to vector<16xf32>
    %41 = vector.shape_cast %40 : vector<16xf32> to vector<16x1xf32>
    %cst_15 = arith.constant 8.000000e+00 : f32
    %42 = vector.broadcast %cst_15 : f32 to vector<16x1xf32>
    %43 = arith.cmpf olt, %41, %42 : vector<16x1xf32>
    %c8_i32 = arith.constant 8 : i32
    %44 = vector.broadcast %c8_i32 : i32 to vector<16x1xi32>
    %45 = arith.muli %24, %44 : vector<16x1xi32>
    %46 = arith.fptosi %41 : vector<16x1xf32> to vector<16x1xi32>
    %47 = arith.addi %45, %46 : vector<16x1xi32>
    %c-1_i32 = arith.constant -1 : i32
    %48 = vector.broadcast %c-1_i32 : i32 to vector<16x1xi32>
    %49 = arith.select %43, %47, %48 : vector<16x1xi1>, vector<16x1xi32>
    %50 = tpu.iota {dimensions = array<i32: 1>} : vector<16x32xi32>
    %51 = vector.broadcast %49 : vector<16x1xi32> to vector<16x32xi32>
    %52 = arith.cmpi eq, %50, %51 : vector<16x32xi32>
    %cst_16 = arith.constant 0.000000e+00 : f32
    %53 = vector.shape_cast %18 : vector<16x1xf32> to vector<16x1xf32>
    %54 = vector.broadcast %53 : vector<16x1xf32> to vector<16x32xf32>
    %55 = vector.broadcast %cst_16 : f32 to vector<16x32xf32>
    %56 = arith.select %52, %54, %55 : vector<16x32xi1>, vector<16x32xf32>
    %c0_17 = arith.constant 0 : index
    %c0_18 = arith.constant 0 : index
    %57 = vector.load %arg3[%c0_17, %c0_18] : memref<16x32xf32, #tpu.memory_space<vmem>>, vector<16x32xf32>
    tpu.vector_store %arg3[%c0_17, %c0_18], %56 {strides = array<i32>} : memref<16x32xf32, #tpu.memory_space<vmem>>, vector<16x32xf32>,
    %c0_19 = arith.constant 0 : index
    %c0_20 = arith.constant 0 : index
    %58 = vector.load %arg4[%c0_19, %c0_20] : memref<16x32xi32, #tpu.memory_space<vmem>>, vector<16x32xi32>
    %59 = arith.extui %52 : vector<16x32xi1> to vector<16x32xi32>
    %cst_21 = arith.constant dense<0> : vector<16x32xi32>
    %60 = arith.cmpi ne, %58, %cst_21 : vector<16x32xi32>
    tpu.vector_store %arg4[%c0_19, %c0_20], %59 {strides = array<i32>} : memref<16x32xi32, #tpu.memory_space<vmem>>, vector<16x32xi32>,
    %cst_22 = arith.constant dense<0.000000e+00> : vector<4xf32>
    %61 = vector.multi_reduction <add>, %28, %cst_22 [0] : vector<16x4xf32> to vector<4xf32>
    %62 = vector.shape_cast %61 : vector<4xf32> to vector<1x4xf32>
    %63 = arith.addf %29, %62 : vector<1x4xf32>
    %c0_23 = arith.constant 0 : index
    %c0_24 = arith.constant 0 : index
    %64 = vector.load %arg8[%c0_23, %c0_24] : memref<1x4xf32, #tpu.memory_space<vmem>>, vector<1x4xf32>
    tpu.vector_store %arg8[%c0_23, %c0_24], %63 {strides = array<i32>} : memref<1x4xf32, #tpu.memory_space<vmem>>, vector<1x4xf32>,
    %c0_25 = arith.constant 0 : index
    %c0_26 = arith.constant 0 : index
    %65 = vector.load %arg9[%c0_25, %c0_26] : memref<1x4xf32, #tpu.memory_space<vmem>>, vector<1x4xf32>
    %cst_27 = arith.constant dense<0.000000e+00> : vector<4xf32>
    %66 = vector.multi_reduction <add>, %15, %cst_27 [0] : vector<16x4xf32> to vector<4xf32>
    %67 = vector.shape_cast %66 : vector<4xf32> to vector<1x4xf32>
    %68 = arith.addf %65, %67 : vector<1x4xf32>
    %c0_28 = arith.constant 0 : index
    %c0_29 = arith.constant 0 : index
    %69 = vector.load %arg9[%c0_28, %c0_29] : memref<1x4xf32, #tpu.memory_space<vmem>>, vector<1x4xf32>
    tpu.vector_store %arg9[%c0_28, %c0_29], %68 {strides = array<i32>} : memref<1x4xf32, #tpu.memory_space<vmem>>, vector<1x4xf32>,
    %c0_i32_30 = arith.constant 0 : i32
    %70 = arith.cmpi eq, %arg0, %c0_i32_30 : i32
    %71 = arith.extui %70 : i1 to i32
    %c0_i32_31 = arith.constant 0 : i32
    %72 = arith.cmpi ne, %71, %c0_i32_31 : i32
    scf.if %72 {
      %c0_32 = arith.constant 0 : index
      %c0_33 = arith.constant 0 : index
      %73 = vector.load %arg8[%c0_32, %c0_33] : memref<1x4xf32, #tpu.memory_space<vmem>>, vector<1x4xf32>
      %c0_34 = arith.constant 0 : index
      %c0_35 = arith.constant 0 : index
      %74 = vector.load %arg9[%c0_34, %c0_35] : memref<1x4xf32, #tpu.memory_space<vmem>>, vector<1x4xf32>
      %75 = arith.mulf %74, %73 : vector<1x4xf32>
      %cst_36 = arith.constant dense<0.000000e+00> : vector<1xf32>
      %76 = vector.multi_reduction <add>, %75, %cst_36 [1] : vector<1x4xf32> to vector<1xf32>
      %77 = vector.shape_cast %76 : vector<1xf32> to vector<1x1xf32>
      %cst_37 = arith.constant 1.562500e-02 : f32
      %78 = vector.broadcast %cst_37 : f32 to vector<1x1xf32>
      %79 = arith.mulf %77, %78 : vector<1x1xf32>
      %c0_38 = arith.constant 0 : index
      %c0_39 = arith.constant 0 : index
      %80 = vector.load %arg5[%c0_38, %c0_39] : memref<1x1xf32, #tpu.memory_space<vmem>>, vector<1x1xf32>
      tpu.vector_store %arg5[%c0_38, %c0_39], %79 {strides = array<i32>} : memref<1x1xf32, #tpu.memory_space<vmem>>, vector<1x1xf32>,
      %81 = arith.fptosi %73 : vector<1x4xf32> to vector<1x4xi32>
      %c0_40 = arith.constant 0 : index
      %c0_41 = arith.constant 0 : index
      %82 = vector.load %arg6[%c0_40, %c0_41] : memref<1x4xi32, #tpu.memory_space<vmem>>, vector<1x4xi32>
      tpu.vector_store %arg6[%c0_40, %c0_41], %81 {strides = array<i32>} : memref<1x4xi32, #tpu.memory_space<vmem>>, vector<1x4xi32>,
    } else {
    }
    return
  }
  func.func @transform_0(%arg0: i32) -> (i32, i32) {
    %c0_i32 = arith.constant 0 : i32
    %c0_i32_0 = arith.constant 0 : i32
    return %arg0, %c0_i32 : i32, i32
  }
  func.func @transform_1(%arg0: i32) -> (i32, i32) {
    %c0_i32 = arith.constant 0 : i32
    %c0_i32_0 = arith.constant 0 : i32
    %c0_i32_1 = arith.constant 0 : i32
    return %c0_i32, %c0_i32_0 : i32, i32
  }
  func.func @transform_2(%arg0: i32) -> (i32, i32) {
    %c0_i32 = arith.constant 0 : i32
    %c0_i32_0 = arith.constant 0 : i32
    return %arg0, %c0_i32 : i32, i32
  }
  func.func @transform_3(%arg0: i32) -> (i32, i32) {
    %c0_i32 = arith.constant 0 : i32
    %c0_i32_0 = arith.constant 0 : i32
    return %arg0, %c0_i32 : i32, i32
  }
  func.func @transform_4(%arg0: i32) -> (i32, i32) {
    %c0_i32 = arith.constant 0 : i32
    %c0_i32_0 = arith.constant 0 : i32
    %c0_i32_1 = arith.constant 0 : i32
    return %c0_i32, %c0_i32_0 : i32, i32
  }
  func.func @transform_5(%arg0: i32) -> (i32, i32) {
    %c0_i32 = arith.constant 0 : i32
    %c0_i32_0 = arith.constant 0 : i32
    %c0_i32_1 = arith.constant 0 : i32
    return %c0_i32, %c0_i32_0 : i32, i32
  }
}

</mosaic_0001>

<bundles_post_ra>
// kernel: tpu_custom_call.1
= control target key start
LH: loop header
LB: loop body
LE: loop exit
PB: predicated region body
PF: predicated region fallthrough
CT: control target
= control target key end

     0   :  { %11 = vsyncpa [#allocation6], 0  ;;  %v469_v1 = vmov 0.0   ;;  %vm470_vm0 = vmmov 0   ;;  %s646_s0 = inlined_call_operand.vmem [shape: f32[16,32], index: 0, kind: input, shape index: {}]   ;;  %s647_s1 = inlined_call_operand.vmem [shape: bf16[32,4], index: 1, kind: input, shape index: {}]   ;;  %s648_s2 = inlined_call_operand.hbm [shape: f32[16,32], index: 2, kind: output, shape index: {0}]   ;;  %s649_s3 = inlined_call_operand.vmem [shape: s32[16,32], index: 3, kind: output, shape index: {1}]   ;;  %s650_s4 = inlined_call_operand.hbm [shape: f32[1,1], index: 4, kind: output, shape index: {2}]   ;;  %s651_s5 = inlined_call_operand.hbm [shape: s32[1,4], index: 5, kind: output, shape index: {3}]  }
   0x1   :  { %v389_v0 = vld [vmem:[%s647_s1] sm:$0xff]   ;;  %360 = vmatprep.subr.bf16.mxu0 %v469_v1  ;;  %v390_v2 = vld [vmem:[%s647_s1 + $0x8] sm:$0xff]   ;;  %368 = vmatprep.subr.bf16.mxu1 %v469_v1 }
   0x2   :  { %361 = vmatpush3.bf16.msra.mxu0 %v389_v0  ;;  %364 = vmatprep.mubr.msk.bf16.mxu0 %vm470_vm0, %v469_v1  ;;  %v39_v3 = vld [vmem:[%s646_s0] sm:$0xff]  ;;  %v40_v4 = vld [vmem:[%s646_s0 + $0x8] sm:$0xff] }
   0x3   :  { %12 = vsyncpa [#allocation8], 0  ;;  %362 = vmatprep.subr.bf16.mxu0 %v469_v1  ;;  %370 = vmatprep.mubr.msk.bf16.mxu1 %vm470_vm0, %v469_v1  ;;  %v41_v5 = vpack.c.bf16 %v40_v4, %v39_v3  ;;  %vm58_vm1 = vcmask 261120   ;;  %vm103_vm2 = vcmask 31744   ;;  %vm22_vm3 = vcmask 24576   ;;  %s472_s0 = smov [#allocation7]  }
   0x4   :  { %24 = vst.msk [vmem:[#allocation4] sm:$0x1] %vm22_vm3, %v469_v1  ;;  %23 = vst.msk [vmem:[#allocation3] sm:$0x1] %vm22_vm3, %v469_v1  ;;  %v25_v41 = vlaneseq  ;;  %vm37_vm10 = vcmask 130048   ;;  %s316_s1 = sshll.u32 %s472_s0, 4  ;;  %s317_s1 = int_to_ptr.vmem [resolvable:$true] %s316_s1 }
   0x5   :  { %s473_s26 = smov [#allocation9]   ;;  %vm292_vm14 = vcmask 0   ;;  %s474_s28 = smov [#allocation5]  }
   0x6   :  { %363 = vmatpush3.bf16.msra.mxu0 %v390_v2  ;;  %v539_v42 = vand.u32 127, %v25_v41  ;;  %v26_v61 = vshrl.u32 %v25_v41, 7  ;;  %s326_s27 = sshll.u32 %s473_s26, 4  ;;  %s301_s29 = sshll.u32 %s474_s28, 4  ;;  %s576_s27 = int_to_ptr.vmem [resolvable:$true] %s326_s27  ;;  %s578_s29 = int_to_ptr.vmem [resolvable:$true] %s301_s29 }
   0x7   :  { %s399_s30 = scalar_lea.vmem %s317_s1, 16  ;;  %s403_s6 = scalar_lea.vmem %s317_s1, 32 }
   0x8   :  { %v27_v62 = vadd.s32 8, %v26_v61  ;;  %vm30_vm8 = vcmp.ge.s32.totalorder %v26_v61, %v539_v42  ;;  %p400_p0 = scmp.ne.s32.totalorder %s317_s1, %s399_s30  ;;  %p404_p1 = scmp.lt.s32.totalorder %s317_s1, %s317_s1 }
   0x9   :  { %365 = vmatmul.mubr.msk.bf16.vlgmr.msra.gmra.mrb[0].mxu0 %vm58_vm1, %v41_v5  ;;  %v343_v63 = vsel %vm30_vm8, 1.0, %v469_v1  ;;  %p405_p2 = scmp.lt.s32.totalorder %s403_s6, %s399_s30 }
   0xa   :  { %vm31_vm9 = vcmp.ge.s32.totalorder %v27_v62, %v539_v42 }
   0xb   :  { %v270_v38 = vld [vmem:[#allocation4] sm:$0x1]  ;;  %v344_v0 = vsel %vm31_vm9, 1.0, %v469_v1  ;;  %p406_p3 = por %p405_p2, %p404_p1 }
   0xc   :  { %v36_v2 = vpack.c.bf16 %v344_v0, %v343_v63 }
   0xd   :  { %p407_p4 = pnand %p406_p3, %p400_p0 }
   0xe   :  { %38 = vst.msk [vmem:[#allocation2] sm:$0xff] %vm37_vm10, %v36_v2 }
  0xdc   :  { %v96_v6 = vpop.f32.mrb[0].mxu0 }
  0xdd   :  { %v366_v7 = vpop.f32.mrb[1].mxu0  ;;  %v104_v8 = vsel %vm103_vm2, %v96_v6, -inf }
  0xde   :  { %105 = vmax.xlane.f32.xlu0 %v104_v8  ;;  %v99_v9 = vpop.f32.mrb[2].mxu0 }
  0xdf   :  { %v367_v10 = vpop.f32.mrb[3].mxu0  ;;  %v107_v11 = vsel %vm103_vm2, %v99_v9, -inf }
  0xe2   :  { %108 = vmax.xlane.f32.xlu0 %v107_v11 }
 0x16b   :  { %v106_v12 = vpop.xlane.xlu0 %105 }
 0x16c   :  { %v110_v13 = vsub.f32 %v96_v6, %v106_v12 }
 0x16e   :  { %v112_v14 = vmul.f32 1.442695, %v110_v13 }
 0x16f   :  { %v109_v15 = vpop.xlane.xlu0 %108 }
 0x170   :  { %391 = vpow2.f32 %v112_v14  ;;  %v111_v16 = vsub.f32 %v99_v9, %v109_v15  ;;  %v471_v15 = vmov 1.0|1.0  }
 0x172   :  { %v114_v17 = vmul.f32 1.442695, %v111_v16  ;;  %v175_v16 = vld [vmem:[#allocation2] sm:$0xff] }
 0x174   :  { %393 = vpow2.f32 %v114_v17 }
 0x17a   :  { %v392_v18 = vpop.eup %391 }
 0x17b   :  { %v116_v19 = vsel %vm103_vm2, %v392_v18, 0.0 }
 0x17c   :  { %117 = vadd.xlane.f32.xlu1 %v116_v19 }
 0x17e   :  { %v394_v20 = vpop.eup %393 }
 0x17f   :  { %v119_v21 = vsel %vm103_vm2, %v394_v20, 0.0 }
 0x180   :  { %120 = vadd.xlane.f32.xlu1 %v119_v21 }
 0x209   :  { %v118_v22 = vpop.xlane.xlu1 %117 }
 0x20a   :  { %395 = vrcp.f32 %v118_v22 }
 0x20d   :  { %v121_v23 = vpop.xlane.xlu1 %120 }
 0x20e   :  { %397 = vrcp.f32 %v121_v23 }
 0x214   :  { %v396_v24 = vpop.eup %395 }
 0x215   :  { %v123_v25 = vmul.f32 %v396_v24, %v392_v18 }
 0x217   :  { %v128_v26 = vsel %vm103_vm2, %v123_v25, -inf  ;;  %v271_v29 = vsel %vm103_vm2, %v123_v25, 0.0 }
 0x218   :  { %v398_v27 = vpop.eup %397  ;;  %129 = vmax.xlane.f32.xlu0 %v128_v26 }
 0x219   :  { %v125_v28 = vmul.f32 %v398_v27, %v394_v20 }
 0x21b   :  { %v131_v30 = vsel %vm103_vm2, %v125_v28, -inf  ;;  %v272_v31 = vsel %vm103_vm2, %v125_v28, 0.0 }
 0x21c   :  { %v273_v32 = vadd.f32 %v272_v31, %v271_v29  ;;  %132 = vmax.xlane.f32.xlu1 %v131_v30  ;;  %v180_v30 = vsub.s32 0, %v26_v61 }
 0x21e   :  { %v274_v33 = vrot.slane %v273_v32, 4 }
 0x220   :  { %v275_v34 = vadd.f32 %v274_v33, %v273_v32 }
 0x222   :  { %v276_v35 = vrot.slane %v275_v34, 2 }
 0x224   :  { %v277_v36 = vadd.f32 %v276_v35, %v275_v34 }
 0x226   :  { %v278_v37 = vrot.slane %v277_v36, 1 }
 0x228   :  { %v279_v39 = vadd.f32 %v278_v37, %v277_v36 }
 0x22a   :  { %v280_v40 = vadd.f32 %v279_v39, %v270_v38 }
 0x22c   :  { %281 = vst.msk [vmem:[#allocation4] sm:$0x1] %vm22_vm3, %v280_v40 }
 0x233   :  { %v286_v41 = vld [vmem:[#allocation4] sm:$0x1] }
 0x2a5   :  { %v541_v43 = vpop.xlane.xlu0 %129 }
 0x2a6   :  { %vm134_vm4 = vcmp.eq.f32.partialorder %v123_v25, %v541_v43  ;;  %v174_v25 = vld [vmem:[#allocation3] sm:$0x1] }
 0x2a7   :  { %v136_v44 = vsel %vm134_vm4, %v539_v42, 4  ;;  %v181_v31 = vrot.slane %v174_v25, %v180_v30 }
 0x2a8   :  { %v138_v45 = vsel %vm103_vm2, %v136_v44, 2147483647 }
 0x2a9   :  { %v546_v46 = vpop.xlane.xlu1 %132  ;;  %v140_v47 = vshra.s32 %v138_v45, 16  ;;  %v139_v53 = vand.u32 65535, %v138_v45 }
 0x2aa   :  { %vm135_vm5 = vcmp.eq.f32.partialorder %v125_v28, %v546_v46 }
 0x2ab   :  { %v137_v48 = vsel %vm135_vm5, %v539_v42, 4  ;;  %v142_v49 = vcvt.s32.f32 %v140_v47  ;;  %v141_v55 = vcvt.s32.f32 %v139_v53 }
 0x2ac   :  { %v153_v50 = vsel %vm103_vm2, %v137_v48, 2147483647 }
 0x2ad   :  { %143 = vmin.xlane.f32.xlu0 %v142_v49  ;;  %v155_v51 = vshra.s32 %v153_v50, 16  ;;  %v154_v56 = vand.u32 65535, %v153_v50 }
 0x2af   :  { %v157_v52 = vcvt.s32.f32 %v155_v51  ;;  %v156_v59 = vcvt.s32.f32 %v154_v56 }
 0x2b1   :  { %158 = vmin.xlane.f32.xlu1 %v157_v52 }
 0x33a   :  { %v144_v54 = vpop.xlane.xlu0 %143 }
 0x33b   :  { %vm145_vm6 = vcmp.eq.f32.partialorder %v142_v49, %v144_v54  ;;  %v150_v3 = vcvt.f32.s32 %v144_v54 }
 0x33c   :  { %v146_v57 = vsel %vm145_vm6, %v141_v55, inf }
 0x33d   :  { %147 = vmin.xlane.f32.xlu0 %v146_v57  ;;  %v151_v5 = vshll.u32 %v150_v3, 16 }
 0x33e   :  { %v159_v58 = vpop.xlane.xlu1 %158 }
 0x33f   :  { %vm160_vm7 = vcmp.eq.f32.partialorder %v157_v52, %v159_v58  ;;  %v165_v6 = vcvt.f32.s32 %v159_v58 }
 0x340   :  { %v161_v60 = vsel %vm160_vm7, %v156_v59, inf }
 0x341   :  { %162 = vmin.xlane.f32.xlu1 %v161_v60  ;;  %v166_v10 = vshll.u32 %v165_v6, 16 }
 0x3ca   :  { %v148_v4 = vpop.xlane.xlu0 %147 }
 0x3cb   :  { %v149_v7 = vcvt.f32.s32 %v148_v4 }
 0x3cd   :  { %v556_v8 = vadd.s32 %v151_v5, %v149_v7 }
 0x3ce   :  { %v163_v9 = vpop.xlane.xlu1 %162 }
 0x3cf   :  { %v164_v11 = vcvt.f32.s32 %v163_v9  ;;  %vm168_vm11 = vcmp.eq.s32.totalorder %v539_v42, %v556_v8  ;;  %v240_v53 = vmul.u32 8, %v556_v8 }
 0x3d0   :  { %v348_v13 = vsel %vm168_vm11, 1.0, %v469_v1 }
 0x3d1   :  { %v560_v12 = vadd.s32 %v166_v10, %v164_v11  ;;  %v258_v17 = vsel %vm103_vm2, %v348_v13, 0.0 }
 0x3d3   :  { %vm169_vm12 = vcmp.eq.s32.totalorder %v539_v42, %v560_v12  ;;  %v241_v57 = vmul.u32 8, %v560_v12 }
 0x3d4   :  { %vm350_vm13 = vmpackc.low %vm169_vm12, %vm168_vm11  ;;  %v349_v14 = vsel %vm169_vm12, 1.0, %v469_v1 }
 0x3d5   :  { %369 = vmatpush3.bf16.msk.msra.mxu1 %vm350_vm13, %v471_v15  ;;  %v259_v18 = vsel %vm103_vm2, %v349_v14, 0.0 }
 0x3d6   :  { %v260_v19 = vadd.f32 %v259_v18, %v258_v17 }
 0x3d8   :  { %371 = vmatmul.mubr.msk.bf16.vlgmr.msra.gmra.mrb[0].mxu1 %vm37_vm10, %v175_v16  ;;  %v261_v20 = vrot.slane %v260_v19, 4 }
 0x3da   :  { %v262_v21 = vadd.f32 %v261_v20, %v260_v19 }
 0x3dc   :  { %v263_v22 = vrot.slane %v262_v21, 2 }
 0x3de   :  { %v264_v23 = vadd.f32 %v263_v22, %v262_v21 }
 0x3e0   :  { %v265_v24 = vrot.slane %v264_v23, 1 }
 0x3e2   :  { %v266_v26 = vadd.f32 %v265_v24, %v264_v23 }
 0x3e4   :  { %v267_v27 = vadd.f32 %v266_v26, %v174_v25 }
 0x3e6   :  { %269 = vst.msk [vmem:[#allocation3] sm:$0x1] %vm22_vm3, %v267_v27 }
 0x3ed   :  { %v285_v1 = vld [vmem:[#allocation3] sm:$0x1] }
 0x3ee   :  { %v378_v28 = vtrunc.f32 %v285_v1  ;;  %v287_v47 = vmul.f32 %v286_v41, %v285_v1 }
 0x3f0   :  { %v379_v29 = vcvt.f32.s32 %v378_v28  ;;  %v288_v49 = vsel %vm22_vm3, %v287_v47, 0.0 }
 0x3f2   :  { %295 = vst.msk [vmem:[#allocation9] sm:$0x1] %vm22_vm3, %v379_v29 }
 0x4ab   :  { %v221_v32 = vpop.f32.mrb[0].mxu1 }
 0x4ac   :  { %v222_v33 = vadd.f32 %v221_v32, %v181_v31  ;;  %v372_v34 = vpop.f32.mrb[1].mxu1 }
 0x4ad   :  { %v224_v35 = vpop.f32.mrb[2].mxu1 }
 0x4ae   :  { %v353_v36 = vadd.f32 -1.0, %v222_v33  ;;  %v225_v37 = vadd.f32 %v224_v35, %v181_v31  ;;  %v373_v38 = vpop.f32.mrb[3].mxu1 }
 0x4b0   :  { %v354_v39 = vadd.f32 -1.0, %v225_v37  ;;  %v230_v40 = vmul.f32 %v353_v36, %v348_v13 }
 0x4b2   :  { %v232_v44 = vsel %vm103_vm2, %v230_v40, 0.0  ;;  %v231_v45 = vmul.f32 %v354_v39, %v349_v14 }
 0x4b3   :  { %233 = vadd.xlane.f32.xlu0 %v232_v44 }
 0x4b4   :  { %v235_v48 = vsel %vm103_vm2, %v231_v45, 0.0 }
 0x4b5   :  { %236 = vadd.xlane.f32.xlu1 %v235_v48 }
 0x4b7   :  { %289 = vadd.xlane.f32.xlu0 %v288_v49 }
 0x540   :  { %v234_v50 = vpop.xlane.xlu0 %233 }
 0x541   :  { %v374_v51 = vtrunc.f32 %v234_v50  ;;  %vm238_vm15 = vcmp.lt.f32.partialorder %v234_v50, 8.0 }
 0x542   :  { %v237_v52 = vpop.xlane.xlu1 %236 }
 0x543   :  { %v375_v54 = vcvt.f32.s32 %v374_v51  ;;  %v376_v55 = vtrunc.f32 %v237_v52  ;;  %vm239_vm2 = vcmp.lt.f32.partialorder %v237_v52, 8.0 }
 0x544   :  { %v290_v56 = vpop.xlane.xlu0 %289 }
 0x545   :  { %v244_v58 = vadd.s32 %v375_v54, %v240_v53  ;;  %v377_v59 = vcvt.f32.s32 %v376_v55  ;;  %v291_v60 = vmul.f32 0.015625, %v290_v56 }
 0x547   :  { %v246_v61 = vsel %vm238_vm15, %v244_v58, 4294967295  ;;  %v245_v62 = vadd.s32 %v377_v59, %v241_v57  ;;  %293 = vst.msk [vmem:[#allocation7] sm:$0x1] %vm292_vm14, %v291_v60 }
 0x548   :  { %vm248_vm0 = vcmp.eq.s32.totalorder %v539_v42, %v246_v61 }
 0x549   :  { %410 = shalt.err (!%p407_p4)
}
 0x54a   :  { %s411_s9 = scalar_lea.hbm %s650_s4, 16 }
 0x54b   :  { %p412_p5 = scmp.ne.s32.totalorder %s650_s4, %s411_s9  ;;  %p415_p6 = scmp.lt.u32.totalorder %s411_s9, %s650_s4 }
 0x54d   :  { %p417_p7 = pnand %p415_p6, %p412_p5 }
 0x54f   :  { %420 = shalt.err (!%p417_p7)
}
 0x550   :  { %319 = dma.vmem_to_hbm [thread:$0]  %s317_s1, 16, %s650_s4, [#allocation8]   ;;  %v250_v63 = vsel %vm248_vm0, %v541_v43, 0.0  ;;  %v247_v0 = vsel %vm239_vm2, %v245_v62, 4294967295  ;;  %v475_v2 = vmov 0  }
 0x551   :  { %v254_v3 = vsel %vm248_vm0, 1, %v475_v2  ;;  %s421_s16 = scalar_lea.vmem %s576_s27, 16  ;;  %s425_s17 = scalar_lea.vmem %s576_s27, 32 }
 0x552   :  { %p422_p8 = scmp.ne.s32.totalorder %s576_s27, %s421_s16  ;;  %p426_p9 = scmp.lt.s32.totalorder %s576_s27, %s576_s27 }
 0x553   :  { %p427_p10 = scmp.lt.s32.totalorder %s425_s17, %s421_s16 }
 0x555   :  { %p428_p11 = por %p427_p10, %p426_p9 }
 0x557   :  { %p429_p12 = pnand %p428_p11, %p422_p8 }
 0x559   :  { %432 = shalt.err (!%p429_p12)
}
 0x55a   :  { %s433_s19 = scalar_lea.hbm %s651_s5, 16 }
 0x55b   :  { %p434_p13 = scmp.ne.s32.totalorder %s651_s5, %s433_s19  ;;  %p437_p0 = scmp.lt.u32.totalorder %s433_s19, %s651_s5 }
 0x55d   :  { %p439_p1 = pnand %p437_p0, %p434_p13 }
 0x55f   :  { %442 = shalt.err (!%p439_p1)
}
 0x560   :  { %329 = dma.vmem_to_hbm [thread:$0]  %s576_s27, 16, %s651_s5, [#allocation8]   ;;  %252 = vst.msk [vmem:[#allocation5] sm:$0xff] %vm58_vm1, %v250_v63  ;;  %vm249_vm3 = vcmp.eq.s32.totalorder %v539_v42, %v247_v0  ;;  %256 = vst.msk [vmem:[%s649_s3] sm:$0xff] %vm58_vm1, %v254_v3 }
 0x561   :  { %v251_v43 = vsel %vm249_vm3, %v546_v46, 0.0  ;;  %v255_v4 = vsel %vm249_vm3, 1, %v475_v2  ;;  %s443_s5 = scalar_lea.vmem %s578_s29, 256  ;;  %p448_p3 = scmp.lt.s32.totalorder %s578_s29, %s578_s29 }
 0x562   :  { %253 = vst.msk [vmem:[#allocation5 + $0x8] sm:$0xff] %vm58_vm1, %v251_v43  ;;  %257 = vst.msk [vmem:[%s649_s3 + $0x8] sm:$0xff] %vm58_vm1, %v255_v4  ;;  %p444_p2 = scmp.ne.s32.totalorder %s578_s29, %s443_s5  ;;  %p449_p4 = scmp.lt.s32.totalorder %s443_s5, %s443_s5 }
 0x564   :  { %p450_p5 = por %p449_p4, %p448_p3 }
 0x566   :  { %p451_p6 = pnand %p450_p5, %p444_p2 }
 0x568   :  { %454 = shalt.err (!%p451_p6)
}
 0x569   :  { %s455_s6 = scalar_lea.hbm %s648_s2, 256 }
 0x56a   :  { %p456_p7 = scmp.ne.s32.totalorder %s648_s2, %s455_s6  ;;  %p459_p8 = scmp.lt.u32.totalorder %s455_s6, %s648_s2 }
 0x56c   :  { %p461_p9 = pnand %p459_p8, %p456_p7 }
 0x56e   :  { %464 = shalt.err (!%p461_p9)
}
 0x56f   :  { %s476_s3 = smov 128   ;;  %s477_s11 = smov 8  }
 0x570   :  { %307 = dma.vmem_to_hbm [thread:$0]  %s578_s29, 256, %s648_s2, [#allocation6], %s476_s3, %s476_s3, %s477_s11  }
 0x571   :  { %465 = dma.done.wait [#allocation6], 256  }
 0x572   :  { %466 = vsyncadd [#allocation6], 4294967040 }
 0x573   :  { %467 = dma.done.wait [#allocation8], 32  }
 0x574   :  { %468 = vsyncadd [#allocation8], 4294967264 }
 0x575   :  { %341 = vsyncpa [#allocation6], 1 }
 0x576   :  { %342 = vsyncpa [#allocation8], 1 }

</bundles_post_ra>
